<compile_context>
chip_gen: v5e
topology: v5e:2x2
jax: 0.10.0
libtpu: 0.0.40
codegen_flags: <defaults>
</compile_context>

<pallas_src>
import jax
import jax.numpy as jnp
from jax.experimental import pallas as pl
from jax.experimental.pallas import tpu as pltpu


def _matmul_loss_kernel(x_ref, w_ref, z_ref, part_ref, acc_ref):
    """One (i, j) output tile; k (innermost grid axis) is the K reduction."""
    k = pl.program_id(2)

    @pl.when(k == 0)
    def _init():
        acc_ref[...] = jnp.zeros_like(acc_ref)

    acc_ref[...] += jnp.dot(
        x_ref[...], w_ref[...], preferred_element_type=jnp.float32
    )

    @pl.when(k == pl.num_programs(2) - 1)
    def _finalize():
        zf = acc_ref[...]                       # finished f32 tile
        z_ref[...] = zf.astype(z_ref.dtype)
        # Per-tile partial sum of squares; reduced to the mean outside the
        # kernel.  Done once per tile (amortized over the K loop).
        part_ref[0, 0] = jnp.sum(zf * zf)


def model_with_loss(x: jax.Array, w: jax.Array, *, tm: int = 256, tn: int = 256,
                    tk: int = 256, use_bf16_inputs: bool = False):
    """Returns (Z, loss) with Z = x @ w and loss = mean(Z**2)."""
    M, K = x.shape
    K2, N = w.shape
    assert K == K2, "inner dimensions must match"

    out_dtype = x.dtype
    if use_bf16_inputs:
        # Optional: bf16 LHS/RHS runs the MXU at its peak rate on v6e/v7x.
        x = x.astype(jnp.bfloat16)
        w = w.astype(jnp.bfloat16)

    # Clamp tiles to the array extents (full-extent blocks are always legal).
    tm = min(tm, M)
    tn = min(tn, N)
    tk = min(tk, K)
    assert M % tm == 0 and N % tn == 0 and K % tk == 0, (
        "this demo wrapper expects tile sizes to divide the array extents")
    gm, gn, gk = M // tm, N // tn, K // tk

    cost = pl.CostEstimate(
        flops=2 * M * N * K,
        transcendentals=0,
        bytes_accessed=4 * (M * K + K * N + M * N),
    )

    z, partials = pl.pallas_call(
        _matmul_loss_kernel,
        out_shape=(
            jax.ShapeDtypeStruct((M, N), out_dtype),
            jax.ShapeDtypeStruct((gm, gn), jnp.float32),
        ),
        grid_spec=pltpu.PrefetchScalarGridSpec(
            num_scalar_prefetch=0,
            grid=(gm, gn, gk),
            in_specs=[
                pl.BlockSpec((tm, tk), lambda i, j, k: (i, k)),   # X tile
                pl.BlockSpec((tk, tn), lambda i, j, k: (k, j)),   # W tile
            ],
            out_specs=[
                pl.BlockSpec((tm, tn), lambda i, j, k: (i, j)),   # Z tile
                pl.BlockSpec((1, 1), lambda i, j, k: (i, j),      # loss partial
                             memory_space=pltpu.SMEM),
            ],
            scratch_shapes=[pltpu.VMEM((tm, tn), jnp.float32)],   # K accumulator
        ),
        compiler_params=pltpu.CompilerParams(
            # M and N tiles are independent (partials are per-(i, j)), so both
            # may be megacore-sharded; only the K reduction is sequential.
            dimension_semantics=("parallel", "parallel", "arbitrary"),
        ),
        cost_estimate=cost,
    )(x, w)

    loss = jnp.sum(partials) / jnp.float32(M * N)
    return z, loss


if __name__ == "__main__":
    key = jax.random.PRNGKey(0)
    kx, kw = jax.random.split(key)

    # --- Case 1: small shapes (full-extent blocks, grid (1, 1, 1)) ----------
    M, K, N = 16, 32, 128
    x = jax.random.normal(kx, (M, K), dtype=jnp.float32)
    w_init = jax.random.normal(kw, (K, N), dtype=jnp.float32) * 0.05

    z, loss = model_with_loss(x, w_init)
    jax.block_until_ready((z, loss))

    z_ref = x @ w_init
    loss_ref = jnp.mean(z_ref ** 2)
    assert jnp.allclose(z, z_ref, atol=1e-4, rtol=1e-4)
    assert jnp.allclose(loss, loss_ref, atol=1e-5, rtol=1e-4)

    # --- Case 2: shapes that exercise the full 3-D tiled grid (2, 2, 2) -----
    M2, K2, N2 = 512, 512, 512
    kx2, kw2 = jax.random.split(jax.random.PRNGKey(0))
    x2 = jax.random.normal(kx2, (M2, K2), dtype=jnp.float32)
    w2 = jax.random.normal(kw2, (K2, N2), dtype=jnp.float32) * 0.05

    z2, loss2 = model_with_loss(x2, w2)
    jax.block_until_ready((z2, loss2))

    z2_ref = x2 @ w2
    loss2_ref = jnp.mean(z2_ref ** 2)
    assert jnp.allclose(z2, z2_ref, atol=2e-3, rtol=2e-3)
    assert jnp.allclose(loss2, loss2_ref, rtol=1e-3)

    print("KERNEL_OK")
</pallas_src>

<mosaic_0001>
module attributes {stable_mosaic.version = 11 : i64} {
  func.func @_matmul_loss_kernel(%arg0: i32, %arg1: i32, %arg2: i32, %arg3: memref<16x32xf32, #tpu.memory_space<vmem>>, %arg4: memref<32x128xf32, #tpu.memory_space<vmem>>, %arg5: memref<16x128xf32, #tpu.memory_space<vmem>>, %arg6: memref<1x1xf32, #tpu.memory_space<smem>>, %arg7: memref<16x128xf32, #tpu.memory_space<vmem>>) attributes {dimension_semantics = [#tpu.dimension_semantics<parallel>, #tpu.dimension_semantics<parallel>, #tpu.dimension_semantics<arbitrary>], iteration_bounds = array<i64: 1, 1, 1>, scalar_prefetch = 0 : i64, scratch_operands = 1 : i64, tpu.core_type = #tpu.core_type<tc>, window_params = [{transform_indices = @transform_0, window_bounds = array<i64: 16, 32>}, {transform_indices = @transform_1, window_bounds = array<i64: 32, 128>}, {transform_indices = @transform_2, window_bounds = array<i64: 16, 128>}, {transform_indices = @transform_3, window_bounds = array<i64: 1, 1>}]} {
    %c0_i32 = arith.constant 0 : i32
    %0 = arith.cmpi eq, %arg2, %c0_i32 : i32
    %1 = arith.extui %0 : i1 to i32
    %c0_i32_0 = arith.constant 0 : i32
    %2 = arith.cmpi ne, %1, %c0_i32_0 : i32
    scf.if %2 {
      %cst_10 = arith.constant 0.000000e+00 : f32
      %12 = vector.broadcast %cst_10 : f32 to vector<16x128xf32>
      %c0_11 = arith.constant 0 : index
      %c0_12 = arith.constant 0 : index
      %13 = vector.load %arg7[%c0_11, %c0_12] : memref<16x128xf32, #tpu.memory_space<vmem>>, vector<16x128xf32>
      tpu.vector_store %arg7[%c0_11, %c0_12], %12 {strides = array<i32>} : memref<16x128xf32, #tpu.memory_space<vmem>>, vector<16x128xf32>,
    } else {
    }
    %c0 = arith.constant 0 : index
    %c0_1 = arith.constant 0 : index
    %3 = vector.load %arg7[%c0, %c0_1] : memref<16x128xf32, #tpu.memory_space<vmem>>, vector<16x128xf32>
    %c0_2 = arith.constant 0 : index
    %c0_3 = arith.constant 0 : index
    %4 = vector.load %arg3[%c0_2, %c0_3] : memref<16x32xf32, #tpu.memory_space<vmem>>, vector<16x32xf32>
    %c0_4 = arith.constant 0 : index
    %c0_5 = arith.constant 0 : index
    %5 = vector.load %arg4[%c0_4, %c0_5] : memref<32x128xf32, #tpu.memory_space<vmem>>, vector<32x128xf32>
    %cst = arith.constant dense<0.000000e+00> : vector<16x128xf32>
    %6 = tpu.matmul %4, %5, %cst {dimension_numbers = #tpu.dot_dimension_numbers<[1], [0], [0], [1], [0, 0, 1, 1], [], []>} : vector<16x32xf32>, vector<32x128xf32>, vector<16x128xf32> -> vector<16x128xf32>
    %7 = arith.addf %3, %6 : vector<16x128xf32>
    %c0_6 = arith.constant 0 : index
    %c0_7 = arith.constant 0 : index
    %8 = vector.load %arg7[%c0_6, %c0_7] : memref<16x128xf32, #tpu.memory_space<vmem>>, vector<16x128xf32>
    tpu.vector_store %arg7[%c0_6, %c0_7], %7 {strides = array<i32>} : memref<16x128xf32, #tpu.memory_space<vmem>>, vector<16x128xf32>,
    %c0_i32_8 = arith.constant 0 : i32
    %9 = arith.cmpi eq, %arg2, %c0_i32_8 : i32
    %10 = arith.extui %9 : i1 to i32
    %c0_i32_9 = arith.constant 0 : i32
    %11 = arith.cmpi ne, %10, %c0_i32_9 : i32
    scf.if %11 {
      %c0_10 = arith.constant 0 : index
      %c0_11 = arith.constant 0 : index
      %12 = vector.load %arg7[%c0_10, %c0_11] : memref<16x128xf32, #tpu.memory_space<vmem>>, vector<16x128xf32>
      %c0_12 = arith.constant 0 : index
      %c0_13 = arith.constant 0 : index
      %13 = vector.load %arg5[%c0_12, %c0_13] : memref<16x128xf32, #tpu.memory_space<vmem>>, vector<16x128xf32>
      tpu.vector_store %arg5[%c0_12, %c0_13], %12 {strides = array<i32>} : memref<16x128xf32, #tpu.memory_space<vmem>>, vector<16x128xf32>,
      %14 = arith.mulf %12, %12 : vector<16x128xf32>
      %15 = vector.shape_cast %14 : vector<16x128xf32> to vector<1x16x128xf32>
      %cst_14 = arith.constant dense<0.000000e+00> : vector<1xf32>
      %16 = vector.multi_reduction <add>, %15, %cst_14 [1, 2] : vector<1x16x128xf32> to vector<1xf32>
      %17 = vector.shape_cast %16 : vector<1xf32> to vector<1x1x1xf32>
      %18 = vector.extract %17[0, 0, 0] : f32 from vector<1x1x1xf32>
      %c0_15 = arith.constant 0 : index
      %c0_16 = arith.constant 0 : index
      %19 = memref.load %arg6[%c0_15, %c0_16] : memref<1x1xf32, #tpu.memory_space<smem>>
      memref.store %18, %arg6[%c0_15, %c0_16] : memref<1x1xf32, #tpu.memory_space<smem>>
    } else {
    }
    return
  }
  func.func @transform_0(%arg0: i32, %arg1: i32, %arg2: i32) -> (i32, i32) {
    %c0_i32 = arith.constant 0 : i32
    return %arg0, %arg2 : i32, i32
  }
  func.func @transform_1(%arg0: i32, %arg1: i32, %arg2: i32) -> (i32, i32) {
    %c0_i32 = arith.constant 0 : i32
    return %arg2, %arg1 : i32, i32
  }
  func.func @transform_2(%arg0: i32, %arg1: i32, %arg2: i32) -> (i32, i32) {
    %c0_i32 = arith.constant 0 : i32
    return %arg0, %arg1 : i32, i32
  }
  func.func @transform_3(%arg0: i32, %arg1: i32, %arg2: i32) -> (i32, i32) {
    %c0_i32 = arith.constant 0 : i32
    return %arg0, %arg1 : i32, i32
  }
}

</mosaic_0001>

<bundles_post_ra>
// kernel: tpu_custom_call.1
= control target key start
LH: loop header
LB: loop body
LE: loop exit
PB: predicated region body
PF: predicated region fallthrough
CT: control target
= control target key end

     0   :  { %9 = vsyncpa [#allocation4], 0  ;;  %s304_s0 = inlined_call_operand.hbm [shape: f32[16,32], index: 0, kind: input, shape index: {}]   ;;  %s305_s1 = inlined_call_operand.hbm [shape: f32[32,128], index: 1, kind: input, shape index: {}]   ;;  %s306_s2 = inlined_call_operand.hbm [shape: f32[16,128], index: 2, kind: output, shape index: {0}]   ;;  %s307_s3 = inlined_call_operand.hbm [shape: f32[1,1], index: 3, kind: output, shape index: {1}]  }
   0x1   :  { %10 = vsyncpa [#allocation8], 0 }
   0x2   :  { %11 = vsyncpa [#allocation5], 0 }
   0x3   :  { %12 = vsyncpa [#allocation6], 0  ;;  %s17_s14 = sshll.u32 %s304_s0, 4  ;;  %s257_s15 = smov [#allocation3]   ;;  %s18_s14 = int_to_ptr.hbm [resolvable:$true] %s17_s14 }
   0x4   :  { %s19_s16 = sshll.u32 %s257_s15, 4  ;;  %s30_s19 = sshll.u32 %s305_s1, 4  ;;  %s20_s16 = int_to_ptr.vmem [resolvable:$true] %s19_s16  ;;  %s31_s19 = int_to_ptr.hbm [resolvable:$true] %s30_s19 }
   0x5   :  { %s258_s20 = smov 128   ;;  %s259_s21 = smov 8  }
   0x6   :  { %25 = dma.hbm_to_vmem [thread:$0]  %s18_s14, 256, %s20_s16, [#allocation4], %s258_s20, %s258_s20, %s259_s21  }
   0x7   :  { %s260_s22 = smov [#allocation7]  }
   0x8   :  { %s32_s23 = sshll.u32 %s260_s22, 4  ;;  %s33_s23 = int_to_ptr.vmem [resolvable:$true] %s32_s23 }
   0x9   :  { %38 = dma.hbm_to_vmem [thread:$0]  %s31_s19, 512, %s33_s23, [#allocation8], %s258_s20, %s258_s20, %s259_s21  }
   0xa   :  { %249 = dma.done.wait [#allocation4], 256  }
   0xb   :  { %250 = vsyncadd [#allocation4], 4294967040 }
   0xc   :  { %251 = dma.done.wait [#allocation8], 512  }
   0xd   :  { %252 = vsyncadd [#allocation8], 4294966784  ;;  %v60_v0 = vld [vmem:[#allocation7 + $0x18] sm:$0xff]  ;;  %v59_v1 = vld [vmem:[#allocation7 + $0x10] sm:$0xff]  ;;  %vm61_vm0 = vcmask 261120   ;;  %s261_s0 = smov [#allocation9]  }
   0xe   :  { %80 = vmatpush.msra.mxu0 %v60_v0  ;;  %153 = vmatpush.msra.mxu1 %v60_v0  ;;  %v58_v2 = vld [vmem:[#allocation7 + $0x8] sm:$0xff]  ;;  %v57_v3 = vld [vmem:[#allocation7] sm:$0xff]  ;;  %v55_v4 = vld [vmem:[#allocation3] sm:$0xff]  ;;  %s120_s1 = sshll.u32 %s261_s0, 4  ;;  %s122_s26 = sshll.u32 %s306_s2, 4  ;;  %s121_s1 = int_to_ptr.vmem [resolvable:$true] %s120_s1  ;;  %s123_s26 = int_to_ptr.hbm [resolvable:$true] %s122_s26 }
   0xf   :  { %v56_v5 = vld [vmem:[#allocation3 + $0x8] sm:$0xff]  ;;  %s134_s29 = sshll.u32 %s307_s3, 4  ;;  %s262_s30 = smov [#allocation10]   ;;  %s135_s29 = int_to_ptr.hbm [resolvable:$true] %s134_s29 }
  0x10   :  { %81 = vmatpush.msra.mxu0 %v59_v1  ;;  %154 = vmatpush.msra.mxu1 %v59_v1 }
  0x12   :  { %82 = vmatpush.msra.mxu0 %v58_v2  ;;  %155 = vmatpush.msra.mxu1 %v58_v2 }
  0x14   :  { %83 = vmatpush.msra.mxu0 %v57_v3  ;;  %156 = vmatpush.msra.mxu1 %v57_v3 }
  0x15   :  { %151 = vmatmul.msk.f32.vlgmr.msra.gmra.mxu0 %vm61_vm0, %v55_v4  ;;  %152 = vmatmul.msk.f32.vlgmr.msra.gmra.mxu1 %vm61_vm0, %v56_v5 }
  0x92   :  { %v85_v6 = vpop.f32.mrf.mxu0  ;;  %v88_v7 = vpop.f32.mrf.mxu1 }
  0x93   :  { %100 = vst [vmem:[#allocation9] sm:$0xff] %v85_v6  ;;  %v102_v8 = vmul.f32 %v85_v6, %v85_v6  ;;  %v103_v9 = vmul.f32 %v88_v7, %v88_v7 }
  0x94   :  { %101 = vst [vmem:[#allocation9 + $0x8] sm:$0xff] %v88_v7 }
  0x95   :  { %v104_v10 = vadd.f32 %v103_v9, %v102_v8  ;;  %128 = dma.vmem_to_hbm [thread:$0]  %s121_s1, 256, %s123_s26, [#allocation5], %s258_s20, %s258_s20, %s259_s21  }
  0x97   :  { %105 = vadd.xlane.f32.xlu0 %v104_v10 }
 0x10a   :  { %v106_v11 = vpop.xlane.xlu0 %105 }
 0x10b   :  { %v107_v12 = vrot.slane %v106_v11, 4 }
 0x10d   :  { %v108_v13 = vadd.f32 %v107_v12, %v106_v11 }
 0x10f   :  { %v109_v14 = vrot.slane %v108_v13, 2 }
 0x111   :  { %v110_v15 = vadd.f32 %v109_v14, %v108_v13 }
 0x113   :  { %v111_v16 = vrot.slane %v110_v15, 1 }
 0x115   :  { %v112_v17 = vadd.f32 %v111_v16, %v110_v15 }
 0x117   :  { %157 = vpush %v112_v17 }
 0x148   :  { %s158_s2 = spop %157 }
 0x149   :  { %115 = sst [smem:[#allocation10]] %s158_s2 }
 0x14a   :  { %137 = dma.smem_to_hbm %s262_s30, 16, %s135_s29, [#allocation6]  }
 0x14b   :  { %253 = dma.done.wait [#allocation5], 256  }
 0x14c   :  { %254 = vsyncadd [#allocation5], 4294967040 }
 0x14d   :  { %255 = dma.done.wait [#allocation6], 16  }
 0x14e   :  { %256 = vsyncadd [#allocation6], 4294967280 }
 0x14f   :  { %146 = sfence }
 0x150   :  { %147 = vsyncpa [#allocation4], 1 }
 0x151   :  { %148 = vsyncpa [#allocation8], 1 }
 0x152   :  { %149 = vsyncpa [#allocation5], 1 }
 0x153   :  { %150 = vsyncpa [#allocation6], 1 }

</bundles_post_ra>
